<compile_context>
chip_gen: v5e
topology: v5e:2x2
jax: 0.10.0
libtpu: 0.0.40
codegen_flags: <defaults>
</compile_context>

<pallas_src>
import jax
import jax.numpy as jnp
from jax import lax
from jax.experimental import pallas as pl
from jax.experimental.pallas import tpu as pltpu


# ----------------------------------------------------------------------------
# Pallas kernel
# ----------------------------------------------------------------------------

def _ed_cos_kernel(x_ref, xres_ref, lam_ref, o_ref):
    """Fused ED_Cos forward for the whole batch.

    x_ref   : (B, C, P) VMEM, P = H*W on the lane axis (raw NCHW layout).
    xres_ref: (B, P, C) VMEM, the SAME buffer reinterpreted row-major
              (the torch `.view` scramble) -- the residual term.
    lam_ref : (1, 1) SMEM, raw lamuda parameter (sigmoid applied in-kernel).
    o_ref   : (B, P, C) VMEM, final output (q_attened + residual); the wrapper
              reshapes it to (B, C, H, W) for free.
    """
    B, C, P = x_ref.shape
    c_idx = (P - 1) // 2

    # sigmoid(lamuda): splat the SMEM scalar into one vreg, exp on the EUP.
    lmd = jax.nn.sigmoid(jnp.full((1, 1), lam_ref[0, 0], dtype=jnp.float32))

    def softmax_lanes(s):                       # softmax over the lane axis
        m = jnp.max(s, axis=1, keepdims=True)
        e = jnp.exp(s - m)
        return e * pl.reciprocal(jnp.sum(e, axis=1, keepdims=True), approx=True)

    for b in range(B):                          # static unroll, B is tiny
        x = x_ref[b]                            # (C, P) lane-dense

        # Sublane reductions over the spectral axis C.
        ssq = jnp.sum(x * x, axis=0, keepdims=True)            # (1, P)  ||x_p||^2
        cent = x[:, c_idx:c_idx + 1]                           # (C, 1)  center vector
        dotp = jnp.sum(x * cent, axis=0, keepdims=True)        # (1, P)  <x_p, c>
        ssq_c = ssq[:, c_idx:c_idx + 1]                        # (1, 1)  ||c||^2

        # Euclidean-distance similarity via the norm identity (clamped >= 0).
        d2 = jnp.maximum(ssq + ssq_c - 2.0 * dotp, 0.0)
        sim_e = pl.reciprocal(1.0 + jnp.sqrt(d2), approx=True)             # (1, P)

        # Cosine similarity: dot / max(||x_p|| * ||c||, 1e-8), via rsqrt.
        sim_cos = dotp * lax.rsqrt(jnp.maximum(ssq * ssq_c, 1e-16))        # (1, P)

        att = lmd * softmax_lanes(sim_e) + (1.0 - lmd) * softmax_lanes(sim_cos)

        y_cp = att * x                                         # (C, P) lane-dense
        # q_attened[p, c] = att[p] * x[c, p]; add the raw-view residual in-kernel.
        o_ref[b] = y_cp.T + xres_ref[b]                        # (P, C)


# ----------------------------------------------------------------------------
# Wrapper (module forward)
# ----------------------------------------------------------------------------

def ed_cos_forward(x_nchw, lamuda):
    """Pallas implementation of ED_Cos.forward. x_nchw: (B, C, H, W) float32."""
    B, C, H, W = x_nchw.shape
    P = H * W
    x = x_nchw.astype(jnp.float32)
    x_cp = x.reshape(B, C, P)           # zero-cost: raw NCHW layout, lane-dense
    x_res = x.reshape(B, P, C)          # zero-cost: raw buffer reinterpretation
                                        # (= the torch `.view(B,-1,h,w)` scramble target)
    lam = jnp.reshape(jnp.asarray(lamuda, jnp.float32), (1, 1))

    y_pc = pl.pallas_call(
        _ed_cos_kernel,
        out_shape=jax.ShapeDtypeStruct((B, P, C), jnp.float32),
        grid=(1,),                      # whole batch in one step (working set ~B*16 KB)
        in_specs=[
            pl.BlockSpec((B, C, P), lambda i: (0, 0, 0)),
            pl.BlockSpec((B, P, C), lambda i: (0, 0, 0)),
            pl.BlockSpec(memory_space=pltpu.MemorySpace.SMEM),
        ],
        out_specs=pl.BlockSpec((B, P, C), lambda i: (0, 0, 0)),
        compiler_params=pltpu.CompilerParams(dimension_semantics=("arbitrary",)),
    )(x_cp, x_res, lam)

    # out = q_attened.contiguous().view(B, -1, h, w) + x  -- residual already
    # added in-kernel; this reshape is a free row-major reinterpretation.
    return y_pc.reshape(B, C, H, W)


# ----------------------------------------------------------------------------
# Pure-JAX reference (mirrors the PyTorch forward) for a sanity check
# ----------------------------------------------------------------------------

def ed_cos_reference(x, lamuda):
    B, C, H, W = x.shape
    P = H * W
    q = x.reshape(B, C, P).transpose(0, 2, 1)                 # (B, P, C)
    cent = q[:, (P - 1) // 2][:, None, :]                     # (B, 1, C)
    e_dist = jnp.sqrt(jnp.sum((cent - q) ** 2, axis=2))       # (B, P)
    sim_e = 1.0 / (1.0 + e_dist)
    qn = jnp.sqrt(jnp.sum(q * q, axis=2))
    cn = jnp.sqrt(jnp.sum(cent * cent, axis=2))               # (B, 1)
    dotp = jnp.sum(q * cent, axis=2)
    sim_cos = dotp / jnp.maximum(qn * cn, 1e-8)
    lmd = jax.nn.sigmoid(jnp.asarray(lamuda, jnp.float32))
    att = lmd * jax.nn.softmax(sim_e, axis=-1) + (1.0 - lmd) * jax.nn.softmax(sim_cos, axis=-1)
    q_att = att[:, :, None] * q                               # (B, P, C)
    return q_att.reshape(B, C, H, W) + x


# ----------------------------------------------------------------------------

if __name__ == "__main__":
    key = jax.random.PRNGKey(0)
    B, C, H, W = 2, 16, 16, 16
    x = jax.random.normal(key, (B, C, H, W), jnp.float32)
    lamuda = jnp.float32(0.5)                      # nn.Parameter(0.5)

    fwd = jax.jit(ed_cos_forward)
    out = jax.block_until_ready(fwd(x, lamuda))

    assert out.shape == (B, C, H, W), out.shape
    assert bool(jnp.all(jnp.isfinite(out)))

    ref = jax.block_until_ready(ed_cos_reference(x, lamuda))
    err = jnp.max(jnp.abs(out - ref))
    assert bool(err < 3e-3), f"max abs error {err}"

    print("KERNEL_OK")
</pallas_src>

<mosaic_0001>
module attributes {stable_mosaic.version = 11 : i64} {
  func.func @_ed_cos_kernel(%arg0: i32, %arg1: memref<2x16x256xf32, #tpu.memory_space<vmem>>, %arg2: memref<2x256x16xf32, #tpu.memory_space<vmem>>, %arg3: memref<1x1xf32, #tpu.memory_space<smem>>, %arg4: memref<2x256x16xf32, #tpu.memory_space<vmem>>) attributes {dimension_semantics = [#tpu.dimension_semantics<arbitrary>], iteration_bounds = array<i64: 1>, scalar_prefetch = 0 : i64, scratch_operands = 0 : i64, tpu.core_type = #tpu.core_type<tc>, window_params = [{pipeline_mode = #tpu.pipeline_mode<synchronous>, transform_indices = @transform_0, window_bounds = array<i64: 2, 16, 256>}, {pipeline_mode = #tpu.pipeline_mode<synchronous>, transform_indices = @transform_1, window_bounds = array<i64: 2, 256, 16>}, {transform_indices = @transform_2, window_bounds = array<i64: 1, 1>}, {pipeline_mode = #tpu.pipeline_mode<synchronous>, transform_indices = @transform_3, window_bounds = array<i64: 2, 256, 16>}]} {
    %c0 = arith.constant 0 : index
    %c0_0 = arith.constant 0 : index
    %0 = memref.load %arg3[%c0, %c0_0] : memref<1x1xf32, #tpu.memory_space<smem>>
    %1 = vector.broadcast %0 : f32 to vector<1x1xf32>
    %2 = arith.negf %1 : vector<1x1xf32>
    %3 = math.exp %2 : vector<1x1xf32>
    %cst = arith.constant 1.000000e+00 : f32
    %4 = vector.broadcast %cst : f32 to vector<1x1xf32>
    %5 = arith.addf %4, %3 : vector<1x1xf32>
    %6 = arith.divf %4, %5 : vector<1x1xf32>
    %c0_1 = arith.constant 0 : index
    %c0_2 = arith.constant 0 : index
    %c0_3 = arith.constant 0 : index
    %7 = vector.load %arg1[%c0_1, %c0_2, %c0_3] : memref<2x16x256xf32, #tpu.memory_space<vmem>>, vector<1x16x256xf32>
    %8 = vector.shape_cast %7 : vector<1x16x256xf32> to vector<16x256xf32>
    %9 = arith.mulf %8, %8 : vector<16x256xf32>
    %cst_4 = arith.constant dense<0.000000e+00> : vector<256xf32>
    %10 = vector.multi_reduction <add>, %9, %cst_4 [0] : vector<16x256xf32> to vector<256xf32>
    %11 = vector.shape_cast %10 : vector<256xf32> to vector<1x256xf32>
    %12 = vector.extract_strided_slice %8 {offsets = [0, 127], sizes = [16, 1], strides = [1, 1]} : vector<16x256xf32> to vector<16x1xf32>
    %13 = vector.broadcast %12 : vector<16x1xf32> to vector<16x256xf32>
    %14 = arith.mulf %8, %13 : vector<16x256xf32>
    %cst_5 = arith.constant dense<0.000000e+00> : vector<256xf32>
    %15 = vector.multi_reduction <add>, %14, %cst_5 [0] : vector<16x256xf32> to vector<256xf32>
    %16 = vector.shape_cast %15 : vector<256xf32> to vector<1x256xf32>
    %17 = vector.extract_strided_slice %11 {offsets = [0, 127], sizes = [1, 1], strides = [1, 1]} : vector<1x256xf32> to vector<1x1xf32>
    %18 = vector.broadcast %17 : vector<1x1xf32> to vector<1x256xf32>
    %19 = arith.addf %11, %18 : vector<1x256xf32>
    %cst_6 = arith.constant 2.000000e+00 : f32
    %20 = vector.broadcast %cst_6 : f32 to vector<1x256xf32>
    %21 = arith.mulf %20, %16 : vector<1x256xf32>
    %22 = arith.subf %19, %21 : vector<1x256xf32>
    %cst_7 = arith.constant 0.000000e+00 : f32
    %23 = vector.broadcast %cst_7 : f32 to vector<1x256xf32>
    %24 = arith.maximumf %22, %23 : vector<1x256xf32>
    %25 = math.sqrt %24 : vector<1x256xf32>
    %cst_8 = arith.constant 1.000000e+00 : f32
    %26 = vector.broadcast %cst_8 : f32 to vector<1x256xf32>
    %27 = arith.addf %26, %25 : vector<1x256xf32>
    %28 = tpu.reciprocal %27 {approx = true} : vector<1x256xf32> -> vector<1x256xf32>
    %29 = vector.broadcast %17 : vector<1x1xf32> to vector<1x256xf32>
    %30 = arith.mulf %11, %29 : vector<1x256xf32>
    %cst_9 = arith.constant 1.000000e-16 : f32
    %31 = vector.broadcast %cst_9 : f32 to vector<1x256xf32>
    %32 = arith.maximumf %30, %31 : vector<1x256xf32>
    %33 = math.rsqrt %32 : vector<1x256xf32>
    %34 = arith.mulf %16, %33 : vector<1x256xf32>
    %cst_10 = arith.constant dense<0xFF800000> : vector<1xf32>
    %35 = vector.multi_reduction <maximumf>, %28, %cst_10 [1] : vector<1x256xf32> to vector<1xf32>
    %36 = vector.shape_cast %35 : vector<1xf32> to vector<1x1xf32>
    %37 = vector.broadcast %36 : vector<1x1xf32> to vector<1x256xf32>
    %38 = arith.subf %28, %37 : vector<1x256xf32>
    %39 = math.exp %38 : vector<1x256xf32>
    %cst_11 = arith.constant dense<0.000000e+00> : vector<1xf32>
    %40 = vector.multi_reduction <add>, %39, %cst_11 [1] : vector<1x256xf32> to vector<1xf32>
    %41 = vector.shape_cast %40 : vector<1xf32> to vector<1x1xf32>
    %42 = tpu.reciprocal %41 {approx = true} : vector<1x1xf32> -> vector<1x1xf32>
    %43 = vector.broadcast %42 : vector<1x1xf32> to vector<1x256xf32>
    %44 = arith.mulf %39, %43 : vector<1x256xf32>
    %45 = vector.broadcast %6 : vector<1x1xf32> to vector<1x256xf32>
    %46 = arith.mulf %45, %44 : vector<1x256xf32>
    %cst_12 = arith.constant 1.000000e+00 : f32
    %47 = vector.broadcast %cst_12 : f32 to vector<1x1xf32>
    %48 = arith.subf %47, %6 : vector<1x1xf32>
    %cst_13 = arith.constant dense<0xFF800000> : vector<1xf32>
    %49 = vector.multi_reduction <maximumf>, %34, %cst_13 [1] : vector<1x256xf32> to vector<1xf32>
    %50 = vector.shape_cast %49 : vector<1xf32> to vector<1x1xf32>
    %51 = vector.broadcast %50 : vector<1x1xf32> to vector<1x256xf32>
    %52 = arith.subf %34, %51 : vector<1x256xf32>
    %53 = math.exp %52 : vector<1x256xf32>
    %cst_14 = arith.constant dense<0.000000e+00> : vector<1xf32>
    %54 = vector.multi_reduction <add>, %53, %cst_14 [1] : vector<1x256xf32> to vector<1xf32>
    %55 = vector.shape_cast %54 : vector<1xf32> to vector<1x1xf32>
    %56 = tpu.reciprocal %55 {approx = true} : vector<1x1xf32> -> vector<1x1xf32>
    %57 = vector.broadcast %56 : vector<1x1xf32> to vector<1x256xf32>
    %58 = arith.mulf %53, %57 : vector<1x256xf32>
    %59 = vector.broadcast %48 : vector<1x1xf32> to vector<1x256xf32>
    %60 = arith.mulf %59, %58 : vector<1x256xf32>
    %61 = arith.addf %46, %60 : vector<1x256xf32>
    %62 = vector.broadcast %61 : vector<1x256xf32> to vector<16x256xf32>
    %63 = arith.mulf %62, %8 : vector<16x256xf32>
    %64 = tpu.transpose %63, [1, 0] : vector<16x256xf32> -> vector<256x16xf32>
    %c0_15 = arith.constant 0 : index
    %c0_16 = arith.constant 0 : index
    %c0_17 = arith.constant 0 : index
    %65 = vector.load %arg2[%c0_15, %c0_16, %c0_17] : memref<2x256x16xf32, #tpu.memory_space<vmem>>, vector<1x256x16xf32>
    %66 = vector.shape_cast %65 : vector<1x256x16xf32> to vector<256x16xf32>
    %67 = arith.addf %64, %66 : vector<256x16xf32>
    %c0_18 = arith.constant 0 : index
    %c0_19 = arith.constant 0 : index
    %c0_20 = arith.constant 0 : index
    %68 = vector.load %arg4[%c0_18, %c0_19, %c0_20] : memref<2x256x16xf32, #tpu.memory_space<vmem>>, vector<1x256x16xf32>
    %69 = vector.shape_cast %68 : vector<1x256x16xf32> to vector<256x16xf32>
    %70 = vector.shape_cast %67 : vector<256x16xf32> to vector<1x256x16xf32>
    tpu.vector_store %arg4[%c0_18, %c0_19, %c0_20], %70 {strides = array<i32>} : memref<2x256x16xf32, #tpu.memory_space<vmem>>, vector<1x256x16xf32>,
    %c1 = arith.constant 1 : index
    %c0_21 = arith.constant 0 : index
    %c0_22 = arith.constant 0 : index
    %71 = vector.load %arg1[%c1, %c0_21, %c0_22] : memref<2x16x256xf32, #tpu.memory_space<vmem>>, vector<1x16x256xf32>
    %72 = vector.shape_cast %71 : vector<1x16x256xf32> to vector<16x256xf32>
    %73 = arith.mulf %72, %72 : vector<16x256xf32>
    %cst_23 = arith.constant dense<0.000000e+00> : vector<256xf32>
    %74 = vector.multi_reduction <add>, %73, %cst_23 [0] : vector<16x256xf32> to vector<256xf32>
    %75 = vector.shape_cast %74 : vector<256xf32> to vector<1x256xf32>
    %76 = vector.extract_strided_slice %72 {offsets = [0, 127], sizes = [16, 1], strides = [1, 1]} : vector<16x256xf32> to vector<16x1xf32>
    %77 = vector.broadcast %76 : vector<16x1xf32> to vector<16x256xf32>
    %78 = arith.mulf %72, %77 : vector<16x256xf32>
    %cst_24 = arith.constant dense<0.000000e+00> : vector<256xf32>
    %79 = vector.multi_reduction <add>, %78, %cst_24 [0] : vector<16x256xf32> to vector<256xf32>
    %80 = vector.shape_cast %79 : vector<256xf32> to vector<1x256xf32>
    %81 = vector.extract_strided_slice %75 {offsets = [0, 127], sizes = [1, 1], strides = [1, 1]} : vector<1x256xf32> to vector<1x1xf32>
    %82 = vector.broadcast %81 : vector<1x1xf32> to vector<1x256xf32>
    %83 = arith.addf %75, %82 : vector<1x256xf32>
    %cst_25 = arith.constant 2.000000e+00 : f32
    %84 = vector.broadcast %cst_25 : f32 to vector<1x256xf32>
    %85 = arith.mulf %84, %80 : vector<1x256xf32>
    %86 = arith.subf %83, %85 : vector<1x256xf32>
    %cst_26 = arith.constant 0.000000e+00 : f32
    %87 = vector.broadcast %cst_26 : f32 to vector<1x256xf32>
    %88 = arith.maximumf %86, %87 : vector<1x256xf32>
    %89 = math.sqrt %88 : vector<1x256xf32>
    %cst_27 = arith.constant 1.000000e+00 : f32
    %90 = vector.broadcast %cst_27 : f32 to vector<1x256xf32>
    %91 = arith.addf %90, %89 : vector<1x256xf32>
    %92 = tpu.reciprocal %91 {approx = true} : vector<1x256xf32> -> vector<1x256xf32>
    %93 = vector.broadcast %81 : vector<1x1xf32> to vector<1x256xf32>
    %94 = arith.mulf %75, %93 : vector<1x256xf32>
    %cst_28 = arith.constant 1.000000e-16 : f32
    %95 = vector.broadcast %cst_28 : f32 to vector<1x256xf32>
    %96 = arith.maximumf %94, %95 : vector<1x256xf32>
    %97 = math.rsqrt %96 : vector<1x256xf32>
    %98 = arith.mulf %80, %97 : vector<1x256xf32>
    %cst_29 = arith.constant dense<0xFF800000> : vector<1xf32>
    %99 = vector.multi_reduction <maximumf>, %92, %cst_29 [1] : vector<1x256xf32> to vector<1xf32>
    %100 = vector.shape_cast %99 : vector<1xf32> to vector<1x1xf32>
    %101 = vector.broadcast %100 : vector<1x1xf32> to vector<1x256xf32>
    %102 = arith.subf %92, %101 : vector<1x256xf32>
    %103 = math.exp %102 : vector<1x256xf32>
    %cst_30 = arith.constant dense<0.000000e+00> : vector<1xf32>
    %104 = vector.multi_reduction <add>, %103, %cst_30 [1] : vector<1x256xf32> to vector<1xf32>
    %105 = vector.shape_cast %104 : vector<1xf32> to vector<1x1xf32>
    %106 = tpu.reciprocal %105 {approx = true} : vector<1x1xf32> -> vector<1x1xf32>
    %107 = vector.broadcast %106 : vector<1x1xf32> to vector<1x256xf32>
    %108 = arith.mulf %103, %107 : vector<1x256xf32>
    %109 = vector.broadcast %6 : vector<1x1xf32> to vector<1x256xf32>
    %110 = arith.mulf %109, %108 : vector<1x256xf32>
    %cst_31 = arith.constant 1.000000e+00 : f32
    %111 = vector.broadcast %cst_31 : f32 to vector<1x1xf32>
    %112 = arith.subf %111, %6 : vector<1x1xf32>
    %cst_32 = arith.constant dense<0xFF800000> : vector<1xf32>
    %113 = vector.multi_reduction <maximumf>, %98, %cst_32 [1] : vector<1x256xf32> to vector<1xf32>
    %114 = vector.shape_cast %113 : vector<1xf32> to vector<1x1xf32>
    %115 = vector.broadcast %114 : vector<1x1xf32> to vector<1x256xf32>
    %116 = arith.subf %98, %115 : vector<1x256xf32>
    %117 = math.exp %116 : vector<1x256xf32>
    %cst_33 = arith.constant dense<0.000000e+00> : vector<1xf32>
    %118 = vector.multi_reduction <add>, %117, %cst_33 [1] : vector<1x256xf32> to vector<1xf32>
    %119 = vector.shape_cast %118 : vector<1xf32> to vector<1x1xf32>
    %120 = tpu.reciprocal %119 {approx = true} : vector<1x1xf32> -> vector<1x1xf32>
    %121 = vector.broadcast %120 : vector<1x1xf32> to vector<1x256xf32>
    %122 = arith.mulf %117, %121 : vector<1x256xf32>
    %123 = vector.broadcast %112 : vector<1x1xf32> to vector<1x256xf32>
    %124 = arith.mulf %123, %122 : vector<1x256xf32>
    %125 = arith.addf %110, %124 : vector<1x256xf32>
    %126 = vector.broadcast %125 : vector<1x256xf32> to vector<16x256xf32>
    %127 = arith.mulf %126, %72 : vector<16x256xf32>
    %128 = tpu.transpose %127, [1, 0] : vector<16x256xf32> -> vector<256x16xf32>
    %c1_34 = arith.constant 1 : index
    %c0_35 = arith.constant 0 : index
    %c0_36 = arith.constant 0 : index
    %129 = vector.load %arg2[%c1_34, %c0_35, %c0_36] : memref<2x256x16xf32, #tpu.memory_space<vmem>>, vector<1x256x16xf32>
    %130 = vector.shape_cast %129 : vector<1x256x16xf32> to vector<256x16xf32>
    %131 = arith.addf %128, %130 : vector<256x16xf32>
    %c1_37 = arith.constant 1 : index
    %c0_38 = arith.constant 0 : index
    %c0_39 = arith.constant 0 : index
    %132 = vector.load %arg4[%c1_37, %c0_38, %c0_39] : memref<2x256x16xf32, #tpu.memory_space<vmem>>, vector<1x256x16xf32>
    %133 = vector.shape_cast %132 : vector<1x256x16xf32> to vector<256x16xf32>
    %134 = vector.shape_cast %131 : vector<256x16xf32> to vector<1x256x16xf32>
    tpu.vector_store %arg4[%c1_37, %c0_38, %c0_39], %134 {strides = array<i32>} : memref<2x256x16xf32, #tpu.memory_space<vmem>>, vector<1x256x16xf32>,
    return
  }
  func.func @transform_0(%arg0: i32) -> (i32, i32, i32) {
    %c0_i32 = arith.constant 0 : i32
    %c0_i32_0 = arith.constant 0 : i32
    %c0_i32_1 = arith.constant 0 : i32
    %c0_i32_2 = arith.constant 0 : i32
    return %c0_i32, %c0_i32_0, %c0_i32_1 : i32, i32, i32
  }
  func.func @transform_1(%arg0: i32) -> (i32, i32, i32) {
    %c0_i32 = arith.constant 0 : i32
    %c0_i32_0 = arith.constant 0 : i32
    %c0_i32_1 = arith.constant 0 : i32
    %c0_i32_2 = arith.constant 0 : i32
    return %c0_i32, %c0_i32_0, %c0_i32_1 : i32, i32, i32
  }
  func.func @transform_2(%arg0: i32) -> (i32, i32) {
    %c0_i32 = arith.constant 0 : i32
    %c0_i32_0 = arith.constant 0 : i32
    %c0_i32_1 = arith.constant 0 : i32
    return %c0_i32, %c0_i32_0 : i32, i32
  }
  func.func @transform_3(%arg0: i32) -> (i32, i32, i32) {
    %c0_i32 = arith.constant 0 : i32
    %c0_i32_0 = arith.constant 0 : i32
    %c0_i32_1 = arith.constant 0 : i32
    %c0_i32_2 = arith.constant 0 : i32
    return %c0_i32, %c0_i32_0, %c0_i32_1 : i32, i32, i32
  }
}

</mosaic_0001>

<bundles_post_ra>
// kernel: ed_cos_forward.1
= control target key start
LH: loop header
LB: loop body
LE: loop exit
PB: predicated region body
PF: predicated region fallthrough
CT: control target
= control target key end

     0   :  { %v817_v3 = vmov 127   ;;  %s1221_s0 = inlined_call_operand.vmem [shape: f32[2,16,256], index: 0, kind: input, shape index: {}]   ;;  %s1222_s1 = inlined_call_operand.vmem [shape: f32[2,256,16], index: 1, kind: input, shape index: {}]   ;;  %s1223_s2 = inlined_call_operand.<no memory space> [shape: f32[1,1], index: 2, kind: input, shape index: {}]   ;;  %s1224_s3 = inlined_call_operand.hbm [shape: f32[2,256,16], index: 3, kind: output, shape index: {}]  }
   0x1   :  { %v844_v0 = vld [vmem:[%s1221_s0 + $0x20] sm:$0xff]  ;;  %v854_v2 = vld [vmem:[%s1221_s0 + $0x30] sm:$0xff]  ;;  %737 = vset.pattern.permute.xlu1 %v817_v3  ;;  %736 = vset.pattern.permute.xlu0 %v817_v3 }
   0x2   :  { %v849_v1 = vld [vmem:[%s1221_s0] sm:$0xff]  ;;  %v361_v4 = vmul.f32 %v844_v0, %v844_v0  ;;  %v363_v6 = vmul.f32 %v854_v2, %v854_v2  ;;  %v865_v7 = vld [vmem:[%s1221_s0 + $0x10] sm:$0xff] }
   0x3   :  { %v41_v5 = vmul.f32 %v849_v1, %v849_v1 }
   0x4   :  { %9 = vsyncpa [#allocation4], 0  ;;  %381 = vperm.xlu1 %737, %v844_v0   ;;  %61 = vperm.xlu0 %736, %v849_v1   ;;  %v43_v8 = vmul.f32 %v865_v7, %v865_v7  ;;  %v365_v9 = vadd.f32 %v363_v6, %v361_v4  ;;  %v882_v23 = vld [vmem:[%s1221_s0 + $0x8] sm:$0xff]  ;;  %v887_v24 = vld [vmem:[%s1221_s0 + $0x18] sm:$0xff]  ;;  %s818_s11 = smov [#allocation3]   ;;  %s682_s15 = sshll.u32 %s1224_s3, 4  ;;  %s683_s15 = int_to_ptr.hbm [resolvable:$true] %s682_s15 }
   0x5   :  { %738 = vset.pattern.permute.xlu2 %v817_v3  ;;  %v42_v25 = vmul.f32 %v882_v23, %v882_v23  ;;  %v44_v26 = vmul.f32 %v887_v24, %v887_v24  ;;  %s680_s12 = sshll.u32 %s818_s11, 4  ;;  %s819_s18 = smov 128   ;;  %s681_s12 = int_to_ptr.vmem [resolvable:$true] %s680_s12 }
   0x6   :  { %v45_v10 = vadd.f32 %v43_v8, %v41_v5  ;;  %v366_v11 = vrot.slane %v365_v9, 4  ;;  %s820_s19 = smov 8  }
   0x7   :  { %v52_v27 = vadd.f32 %v44_v26, %v42_v25 }
   0x8   :  { %v46_v12 = vrot.slane %v45_v10, 4  ;;  %v367_v13 = vadd.f32 %v366_v11, %v365_v9 }
   0x9   :  { %v53_v28 = vrot.slane %v52_v27, 4 }
   0xa   :  { %v47_v14 = vadd.f32 %v46_v12, %v45_v10  ;;  %v368_v16 = vrot.slane %v367_v13, 2 }
   0xb   :  { %v54_v29 = vadd.f32 %v53_v28, %v52_v27 }
   0xc   :  { %386 = vperm.xlu1 %737, %v854_v2   ;;  %66 = vperm.xlu0 %736, %v865_v7   ;;  %v48_v15 = vrot.slane %v47_v14, 2  ;;  %v369_v19 = vadd.f32 %v368_v16, %v367_v13 }
   0xd   :  { %v55_v30 = vrot.slane %v54_v29, 2 }
   0xe   :  { %v49_v17 = vadd.f32 %v48_v15, %v47_v14  ;;  %v370_v21 = vrot.slane %v369_v19, 1 }
   0xf   :  { %v56_v31 = vadd.f32 %v55_v30, %v54_v29 }
  0x10   :  { %v50_v18 = vrot.slane %v49_v17, 1  ;;  %v876_v22 = vadd.f32 %v370_v21, %v369_v19 }
  0x11   :  { %v57_v32 = vrot.slane %v56_v31, 1 }
  0x12   :  { %v873_v20 = vadd.f32 %v50_v18, %v49_v17 }
  0x13   :  { %v58_v33 = vadd.f32 %v57_v32, %v56_v31 }
  0x14   :  { %89 = vperm.xlu2 %738, %v873_v20  }
  0x1c   :  { %409 = vperm.xlu2 %738, %v876_v22  }
  0x6e   :  { %v90_v34 = vpop.permute.xlu2 %89 }
  0x6f   :  { %v128_v35 = vmul.f32 %v90_v34, %v873_v20  ;;  %v129_v36 = vmul.f32 %v90_v34, %v58_v33  ;;  %v92_v13 = vadd.f32 %v90_v34, %v873_v20  ;;  %v93_v16 = vadd.f32 %v90_v34, %v58_v33 }
  0x71   :  { %v130_v37 = vmax.f32 %v128_v35, 1e-16  ;;  %v131_v38 = vmax.f32 %v129_v36, 1e-16 }
  0x73   :  { %739 = vrsqrt.f32 %v130_v37  ;;  %vm138_vm0 = vweird.f32 %v130_v37  ;;  %vm148_vm2 = vweird.f32 %v131_v38 }
  0x74   :  { %741 = vrsqrt.f32 %v131_v38 }
  0x76   :  { %v62_v39 = vpop.permute.xlu0 %61 }
  0x77   :  { %v69_v47 = vmul.f32 %v62_v39, %v849_v1  ;;  %v70_v48 = vmul.f32 %v62_v39, %v882_v23 }
  0x79   :  { %v740_v40 = vpop.eup %739 }
  0x7a   :  { %v742_v41 = vpop.eup %741  ;;  %v133_v42 = vmul.f32 %v740_v40, %v130_v37  ;;  %vm139_vm1 = vweird.f32 %v740_v40 }
  0x7b   :  { %v143_v43 = vmul.f32 %v742_v41, %v131_v38  ;;  %vm149_vm3 = vweird.f32 %v742_v41  ;;  %vm140_vm4 = vmor %vm138_vm0, %vm139_vm1 }
  0x7c   :  { %v134_v44 = vmul.f32 %v740_v40, %v133_v42  ;;  %vm150_vm5 = vmor %vm148_vm2, %vm149_vm3 }
  0x7d   :  { %v144_v45 = vmul.f32 %v742_v41, %v143_v43 }
  0x7e   :  { %v67_v46 = vpop.permute.xlu0 %66  ;;  %v135_v51 = vmul.f32 0.5, %v134_v44 }
  0x7f   :  { %v71_v49 = vmul.f32 %v67_v46, %v865_v7  ;;  %v72_v50 = vmul.f32 %v67_v46, %v887_v24  ;;  %v145_v54 = vmul.f32 0.5, %v144_v45 }
  0x80   :  { %v136_v57 = vsub.f32 1.5, %v135_v51 }
  0x81   :  { %v73_v52 = vadd.f32 %v71_v49, %v69_v47  ;;  %v80_v53 = vadd.f32 %v72_v50, %v70_v48  ;;  %v146_v59 = vsub.f32 1.5, %v145_v54  ;;  %v382_v49 = vpop.permute.xlu1 %381  ;;  %v914_v54 = vld [vmem:[%s1221_s0 + $0x28] sm:$0xff] }
  0x82   :  { %v137_v63 = vmul.f32 %v740_v40, %v136_v57 }
  0x83   :  { %v74_v55 = vrot.slane %v73_v52, 4  ;;  %v81_v56 = vrot.slane %v80_v53, 4  ;;  %v147_v4 = vmul.f32 %v742_v41, %v146_v59 }
  0x84   :  { %v141_v9 = vsel %vm140_vm4, %v740_v40, %v137_v63 }
  0x85   :  { %v75_v58 = vadd.f32 %v74_v55, %v73_v52  ;;  %v82_v60 = vadd.f32 %v81_v56, %v80_v53  ;;  %v151_v11 = vsel %vm150_vm5, %v742_v41, %v147_v4  ;;  %v389_v55 = vmul.f32 %v844_v0, %v382_v49  ;;  %v920_v56 = vld [vmem:[%s1221_s0 + $0x38] sm:$0xff] }
  0x87   :  { %v76_v61 = vrot.slane %v75_v58, 2  ;;  %v83_v62 = vrot.slane %v82_v60, 2 }
  0x89   :  { %v77_v3 = vadd.f32 %v76_v61, %v75_v58  ;;  %v84_v5 = vadd.f32 %v83_v62, %v82_v60  ;;  %v387_v53 = vpop.permute.xlu1 %386  ;;  %v390_v58 = vmul.f32 %v914_v54, %v382_v49  ;;  %v362_v61 = vmul.f32 %v914_v54, %v914_v54 }
  0x8a   :  { %v391_v57 = vmul.f32 %v854_v2, %v387_v53  ;;  %v392_v59 = vmul.f32 %v920_v56, %v387_v53  ;;  %v364_v62 = vmul.f32 %v920_v56, %v920_v56 }
  0x8b   :  { %v78_v6 = vrot.slane %v77_v3, 1  ;;  %v85_v8 = vrot.slane %v84_v5, 1 }
  0x8c   :  { %v393_v60 = vadd.f32 %v391_v57, %v389_v55  ;;  %v400_v63 = vadd.f32 %v392_v59, %v390_v58  ;;  %v372_v4 = vadd.f32 %v364_v62, %v362_v61 }
  0x8d   :  { %v79_v10 = vadd.f32 %v78_v6, %v77_v3  ;;  %v86_v12 = vadd.f32 %v85_v8, %v84_v5 }
  0x8e   :  { %v394_v3 = vrot.slane %v393_v60, 4  ;;  %v401_v5 = vrot.slane %v400_v63, 4  ;;  %v373_v8 = vrot.slane %v372_v4, 4 }
  0x8f   :  { %v94_v14 = vmul.f32 2.0, %v79_v10  ;;  %v899_v15 = vmul.f32 %v141_v9, %v79_v10  ;;  %v95_v17 = vmul.f32 2.0, %v86_v12  ;;  %v901_v18 = vmul.f32 %v151_v11, %v86_v12 }
  0x90   :  { %v395_v6 = vadd.f32 %v394_v3, %v393_v60  ;;  %v402_v9 = vadd.f32 %v401_v5, %v400_v63  ;;  %v374_v11 = vadd.f32 %v373_v8, %v372_v4 }
  0x91   :  { %v96_v19 = vsub.f32 %v92_v13, %v94_v14  ;;  %v172_v21 = vmax.f32 %v899_v15, %v901_v18  ;;  %v97_v25 = vsub.f32 %v93_v16, %v95_v17 }
  0x92   :  { %v396_v10 = vrot.slane %v395_v6, 2  ;;  %v403_v12 = vrot.slane %v402_v9, 2  ;;  %v375_v14 = vrot.slane %v374_v11, 2 }
  0x93   :  { %v98_v26 = vmax.f32 %v96_v19, 0.0  ;;  %173 = vmax.xlane.f32.xlu2 %v172_v21  ;;  %v99_v27 = vmax.f32 %v97_v25, 0.0 }
  0x94   :  { %v397_v13 = vadd.f32 %v396_v10, %v395_v6  ;;  %v404_v16 = vadd.f32 %v403_v12, %v402_v9  ;;  %v376_v19 = vadd.f32 %v375_v14, %v374_v11 }
  0x95   :  { %743 = vrsqrt.f32 %v98_v26  ;;  %vm107_vm6 = vcmp.eq.f32.partialorder %v98_v26, inf  ;;  %v110_v40 = vand.u32 2147483648, %v98_v26  ;;  %vm109_vm7 = vcmp.eq.f32.partialorder %v98_v26, 0.0 }
  0x96   :  { %745 = vrsqrt.f32 %v99_v27  ;;  %vm119_vm8 = vcmp.eq.f32.partialorder %v99_v27, inf  ;;  %v122_v43 = vand.u32 2147483648, %v99_v27  ;;  %vm121_vm9 = vcmp.eq.f32.partialorder %v99_v27, 0.0 }
  0x97   :  { %v398_v17 = vrot.slane %v397_v13, 1  ;;  %v405_v21 = vrot.slane %v404_v16, 1 }
  0x99   :  { %v929_v25 = vadd.f32 %v398_v17, %v397_v13 }
  0x9b   :  { %v744_v28 = vpop.eup %743 }
  0x9c   :  { %v746_v29 = vpop.eup %745  ;;  %v101_v20 = vmul.f32 %v744_v28, %v98_v26 }
  0x9d   :  { %v113_v30 = vmul.f32 %v746_v29, %v99_v27 }
  0x9e   :  { %v102_v31 = vmul.f32 %v744_v28, %v101_v20 }
  0x9f   :  { %v114_v32 = vmul.f32 %v746_v29, %v113_v30 }
  0xa0   :  { %v103_v33 = vmul.f32 0.5, %v102_v31 }
  0xa1   :  { %v115_v34 = vmul.f32 0.5, %v114_v32 }
  0xa2   :  { %v104_v35 = vsub.f32 1.5, %v103_v33 }
  0xa3   :  { %v116_v36 = vsub.f32 1.5, %v115_v34 }
  0xa4   :  { %v105_v37 = vmul.f32 %v744_v28, %v104_v35  ;;  %v414_v28 = vmul.f32 2.0, %v929_v25 }
  0xa5   :  { %v117_v38 = vmul.f32 %v746_v29, %v116_v36  ;;  %v410_v29 = vpop.permute.xlu2 %409 }
  0xa6   :  { %v106_v39 = vmul.f32 %v105_v37, %v98_v26  ;;  %v412_v31 = vadd.f32 %v410_v29, %v876_v22 }
  0xa7   :  { %v118_v41 = vmul.f32 %v117_v38, %v99_v27 }
  0xa8   :  { %v108_v42 = vsel %vm107_vm6, %v98_v26, %v106_v39  ;;  %v377_v26 = vrot.slane %v376_v19, 1  ;;  %v416_v33 = vsub.f32 %v412_v31, %v414_v28 }
  0xa9   :  { %v111_v44 = vsel %vm109_vm7, %v110_v40, %v108_v42  ;;  %v120_v45 = vsel %vm119_vm8, %v99_v27, %v118_v41  ;;  %v931_v27 = vadd.f32 %v405_v21, %v404_v16  ;;  %vm323_vm8 = vcmask 130048  }
  0xaa   :  { %v123_v46 = vsel %vm121_vm9, %v122_v43, %v120_v45  ;;  %v124_v47 = vadd.f32 1.0, %v111_v44  ;;  %v378_v20 = vadd.f32 %v377_v26, %v376_v19  ;;  %v418_v35 = vmax.f32 %v416_v33, 0.0 }
  0xab   :  { %v125_v48 = vadd.f32 1.0, %v123_v46  ;;  %v415_v30 = vmul.f32 2.0, %v931_v27  ;;  %v448_v43 = vmul.f32 %v410_v29, %v876_v22 }
  0xac   :  { %747 = vrcp.f32 %v124_v47  ;;  %v413_v32 = vadd.f32 %v410_v29, %v378_v20  ;;  %v449_v45 = vmul.f32 %v410_v29, %v378_v20  ;;  %vm427_vm10 = vcmp.eq.f32.partialorder %v418_v35, inf }
  0xad   :  { %749 = vrcp.f32 %v125_v48  ;;  %v450_v47 = vmax.f32 %v448_v43, 1e-16  ;;  %v430_v4 = vand.u32 2147483648, %v418_v35  ;;  %vm429_vm12 = vcmp.eq.f32.partialorder %v418_v35, 0.0 }
  0xae   :  { %v417_v34 = vsub.f32 %v413_v32, %v415_v30  ;;  %751 = vrsqrt.f32 %v418_v35  ;;  %v451_v49 = vmax.f32 %v449_v45, 1e-16 }
  0xaf   :  { %vm458_vm14 = vweird.f32 %v450_v47 }
  0xb0   :  { %v419_v36 = vmax.f32 %v417_v34, 0.0  ;;  %vm468_vm0 = vweird.f32 %v451_v49 }
  0xb2   :  { %v905_v50 = vpop.eup %747  ;;  %753 = vrsqrt.f32 %v419_v36  ;;  %vm439_vm11 = vcmp.eq.f32.partialorder %v419_v36, inf  ;;  %v442_v10 = vand.u32 2147483648, %v419_v36  ;;  %vm441_vm13 = vcmp.eq.f32.partialorder %v419_v36, 0.0 }
  0xb3   :  { %v907_v51 = vpop.eup %749  ;;  %755 = vrsqrt.f32 %v450_v47 }
  0xb4   :  { %v154_v52 = vmax.f32 %v905_v50, %v907_v51  ;;  %v752_v37 = vpop.eup %751  ;;  %757 = vrsqrt.f32 %v451_v49 }
  0xb5   :  { %v421_v39 = vmul.f32 %v752_v37, %v418_v35 }
  0xb6   :  { %155 = vmax.xlane.f32.xlu0 %v154_v52 }
  0xb7   :  { %v422_v41 = vmul.f32 %v752_v37, %v421_v39 }
  0xb8   :  { %v754_v38 = vpop.eup %753 }
  0xb9   :  { %v433_v40 = vmul.f32 %v754_v38, %v419_v36  ;;  %v423_v44 = vmul.f32 0.5, %v422_v41  ;;  %v756_v58 = vpop.eup %755 }
  0xba   :  { %v758_v60 = vpop.eup %757  ;;  %v453_v3 = vmul.f32 %v756_v58, %v450_v47  ;;  %vm459_vm15 = vweird.f32 %v756_v58 }
  0xbb   :  { %v434_v42 = vmul.f32 %v754_v38, %v433_v40  ;;  %v424_v48 = vsub.f32 1.5, %v423_v44  ;;  %v463_v6 = vmul.f32 %v758_v60, %v451_v49  ;;  %vm469_vm1 = vweird.f32 %v758_v60  ;;  %vm460_vm2 = vmor %vm458_vm14, %vm459_vm15 }
  0xbc   :  { %v454_v13 = vmul.f32 %v756_v58, %v453_v3  ;;  %vm470_vm3 = vmor %vm468_vm0, %vm469_vm1 }
  0xbd   :  { %v435_v46 = vmul.f32 0.5, %v434_v42  ;;  %v425_v53 = vmul.f32 %v752_v37, %v424_v48  ;;  %v464_v14 = vmul.f32 %v758_v60, %v463_v6 }
  0xbf   :  { %v436_v52 = vsub.f32 1.5, %v435_v46  ;;  %v426_v57 = vmul.f32 %v425_v53, %v418_v35  ;;  %v465_v17 = vmul.f32 0.5, %v464_v14 }
  0xc1   :  { %v437_v55 = vmul.f32 %v754_v38, %v436_v52  ;;  %v428_v63 = vsel %vm427_vm10, %v418_v35, %v426_v57  ;;  %v466_v29 = vsub.f32 1.5, %v465_v17 }
  0xc2   :  { %v431_v11 = vsel %vm429_vm12, %v430_v4, %v428_v63 }
  0xc3   :  { %v438_v59 = vmul.f32 %v437_v55, %v419_v36  ;;  %v467_v32 = vmul.f32 %v758_v60, %v466_v29 }
  0xc5   :  { %v440_v5 = vsel %vm439_vm11, %v419_v36, %v438_v59  ;;  %v471_v35 = vsel %vm470_vm3, %v758_v60, %v467_v32 }
  0xc6   :  { %v443_v12 = vsel %vm441_vm13, %v442_v10, %v440_v5  ;;  %v473_v37 = vmul.f32 %v471_v35, %v931_v27 }
  0xc7   :  { %v445_v16 = vadd.f32 1.0, %v443_v12 }
 0x106   :  { %v174_v61 = vpop.xlane.xlu2 %173 }
 0x107   :  { %v175_v62 = vsub.f32 %v899_v15, %v174_v61  ;;  %v176_v22 = vsub.f32 %v901_v18, %v174_v61  ;;  %v444_v15 = vadd.f32 1.0, %v431_v11  ;;  %v455_v18 = vmul.f32 0.5, %v454_v13 }
 0x109   :  { %v177_v8 = vmul.f32 1.442695, %v175_v62  ;;  %v179_v9 = vmul.f32 1.442695, %v176_v22  ;;  %v456_v28 = vsub.f32 1.5, %v455_v18 }
 0x10b   :  { %759 = vpow2.f32 %v177_v8  ;;  %v457_v31 = vmul.f32 %v756_v58, %v456_v28 }
 0x10c   :  { %761 = vpow2.f32 %v179_v9 }
 0x10d   :  { %763 = vrcp.f32 %v444_v15  ;;  %v461_v34 = vsel %vm460_vm2, %v756_v58, %v457_v31 }
 0x10e   :  { %765 = vrcp.f32 %v445_v16  ;;  %v472_v36 = vmul.f32 %v461_v34, %v929_v25  ;;  %v17_v25 = vstv %s1223_s2 }
 0x10f   :  { %v694_v27 = vmul.f32 -1.442695, %v17_v25 }
 0x110   :  { %v491_v38 = vmax.f32 %v472_v36, %v473_v37 }
 0x111   :  { %v939_v19 = vpop.eup %759 }
 0x112   :  { %v941_v21 = vpop.eup %761 }
 0x113   :  { %v181_v26 = vadd.f32 %v941_v21, %v939_v19  ;;  %v764_v20 = vpop.eup %763 }
 0x114   :  { %v766_v30 = vpop.eup %765 }
 0x115   :  { %182 = vadd.xlane.f32.xlu2 %v181_v26  ;;  %v474_v33 = vmax.f32 %v764_v20, %v766_v30 }
 0x11d   :  { %475 = vmax.xlane.f32.xlu2 %v474_v33 }
 0x125   :  { %492 = vmax.xlane.f32.xlu2 %v491_v38 }
 0x129   :  { %v156_v39 = vpop.xlane.xlu0 %155 }
 0x12a   :  { %v157_v40 = vsub.f32 %v905_v50, %v156_v39  ;;  %v158_v41 = vsub.f32 %v907_v51, %v156_v39 }
 0x12c   :  { %v159_v42 = vmul.f32 1.442695, %v157_v40  ;;  %v161_v43 = vmul.f32 1.442695, %v158_v41 }
 0x12e   :  { %767 = vpow2.f32 %v159_v42 }
 0x12f   :  { %769 = vpow2.f32 %v161_v43 }
 0x130   :  { %771 = vpow2.f32 %v694_v27 }
 0x134   :  { %v768_v44 = vpop.eup %767 }
 0x135   :  { %v770_v45 = vpop.eup %769 }
 0x136   :  { %v163_v46 = vadd.f32 %v770_v45, %v768_v44  ;;  %v772_v48 = vpop.eup %771 }
 0x137   :  { %v21_v49 = vadd.f32 1.0, %v772_v48 }
 0x138   :  { %164 = vadd.xlane.f32.xlu1 %v163_v46 }
 0x139   :  { %773 = vrcp.f32 %v21_v49  ;;  %vm27_vm4 = vweird.f32 %v21_v49  ;;  %v33_v11 = vand.u32 2147483648, %v21_v49  ;;  %v31_v13 = vand.u32 2147483647, %v21_v49 }
 0x13b   :  { %v34_v14 = vor.u32 1.1754944e-38, %v33_v11  ;;  %vm32_vm7 = vcmp.eq.f32.partialorder %v31_v13, 8.507059e+37  ;;  %v267_v13 = vld [vmem:[%s1222_s1 + $0x40] sm:$0xff] }
 0x13f   :  { %v774_v57 = vpop.eup %773 }
 0x140   :  { %v23_v61 = vmul.f32 %v774_v57, %v21_v49  ;;  %vm28_vm5 = vweird.f32 %v774_v57 }
 0x141   :  { %vm29_vm6 = vmor %vm27_vm4, %vm28_vm5 }
 0x142   :  { %v24_v5 = vsub.f32 1.0, %v23_v61 }
 0x144   :  { %v25_v6 = vmul.f32 %v774_v57, %v24_v5 }
 0x146   :  { %v26_v12 = vadd.f32 %v774_v57, %v25_v6  ;;  %v265_v6 = vld [vmem:[%s1222_s1 + $0x30] sm:$0xff] }
 0x148   :  { %v30_v16 = vsel %vm29_vm6, %v774_v57, %v26_v12 }
 0x149   :  { %v35_v17 = vsel %vm32_vm7, %v34_v14, %v30_v16  ;;  %v268_v16 = vld [vmem:[%s1222_s1 + $0x48] sm:$0xff] }
 0x14a   :  { %v171_v29 = vsub.f32 1.0, %v35_v17 }
 0x188   :  { %v183_v47 = vpop.xlane.xlu2 %182 }
 0x190   :  { %v476_v50 = vpop.xlane.xlu2 %475 }
 0x191   :  { %v477_v52 = vsub.f32 %v764_v20, %v476_v50  ;;  %v478_v51 = vsub.f32 %v766_v30, %v476_v50 }
 0x193   :  { %v479_v53 = vmul.f32 1.442695, %v477_v52  ;;  %v481_v55 = vmul.f32 1.442695, %v478_v51  ;;  %v259_v51 = vld [vmem:[%s1222_s1] sm:$0xff] }
 0x195   :  { %775 = vpow2.f32 %v479_v53 }
 0x196   :  { %777 = vpow2.f32 %v481_v55 }
 0x198   :  { %v493_v58 = vpop.xlane.xlu2 %492 }
 0x199   :  { %v494_v59 = vsub.f32 %v472_v36, %v493_v58  ;;  %v495_v60 = vsub.f32 %v473_v37, %v493_v58 }
 0x19b   :  { %v776_v62 = vpop.eup %775  ;;  %v496_v22 = vmul.f32 1.442695, %v494_v59  ;;  %v498_v63 = vmul.f32 1.442695, %v495_v60  ;;  %v262_v59 = vld [vmem:[%s1222_s1 + $0x18] sm:$0xff] }
 0x19c   :  { %v778_v3 = vpop.eup %777 }
 0x19d   :  { %779 = vpow2.f32 %v496_v22  ;;  %v483_v4 = vadd.f32 %v778_v3, %v776_v62 }
 0x19e   :  { %781 = vpow2.f32 %v498_v63 }
 0x19f   :  { %484 = vadd.xlane.f32.xlu2 %v483_v4  ;;  %783 = vrcp.f32 %v183_v47 }
 0x1a3   :  { %v780_v8 = vpop.eup %779 }
 0x1a4   :  { %v782_v9 = vpop.eup %781 }
 0x1a5   :  { %v500_v10 = vadd.f32 %v782_v9, %v780_v8  ;;  %v784_v18 = vpop.eup %783 }
 0x1a6   :  { %v185_v26 = vmul.f32 %v784_v18, %v939_v19  ;;  %v186_v28 = vmul.f32 %v784_v18, %v941_v21 }
 0x1a7   :  { %501 = vadd.xlane.f32.xlu2 %v500_v10  ;;  %v266_v10 = vld [vmem:[%s1222_s1 + $0x38] sm:$0xff] }
 0x1a8   :  { %v188_v33 = vmul.f32 %v186_v28, %v171_v29  ;;  %v187_v35 = vmul.f32 %v185_v26, %v171_v29  ;;  %v269_v26 = vld [vmem:[%s1222_s1 + $0x50] sm:$0xff] }
 0x1ab   :  { %v165_v15 = vpop.xlane.xlu1 %164 }
 0x1ac   :  { %785 = vrcp.f32 %v165_v15 }
 0x1b2   :  { %v786_v20 = vpop.eup %785 }
 0x1b3   :  { %v167_v30 = vmul.f32 %v786_v20, %v768_v44  ;;  %v168_v31 = vmul.f32 %v786_v20, %v770_v45  ;;  %v270_v20 = vld [vmem:[%s1222_s1 + $0x58] sm:$0xff] }
 0x1b5   :  { %v170_v32 = vmul.f32 %v168_v31, %v35_v17  ;;  %v169_v34 = vmul.f32 %v167_v30, %v35_v17 }
 0x1b7   :  { %v190_v36 = vadd.f32 %v188_v33, %v170_v32  ;;  %v189_v37 = vadd.f32 %v187_v35, %v169_v34  ;;  %v275_v32 = vld [vmem:[%s1222_s1 + $0x80] sm:$0xff] }
 0x1b8   :  { %v271_v35 = vld [vmem:[%s1222_s1 + $0x60] sm:$0xff] }
 0x1b9   :  { %v192_v38 = vmul.f32 %v190_v36, %v882_v23  ;;  %v191_v39 = vmul.f32 %v189_v37, %v849_v1  ;;  %v194_v19 = vmul.f32 %v190_v36, %v887_v24  ;;  %v193_v21 = vmul.f32 %v189_v37, %v865_v7 }
 0x1bb   :  { %227 = vxpose.xlu1.b32.start [1/2] (short) %v192_v38, 128  ;;  %195 = vxpose.xlu0.b32.start [1/2] (short) %v191_v39, 128  ;;  %v699_v38 = vld [vmem:[%s1222_s1 + $0x100] sm:$0xff]  ;;  %v276_v39 = vld [vmem:[%s1222_s1 + $0x88] sm:$0xff] }
 0x1c3   :  { %228 = vxpose.xlu1.b32.end [2/2] (short) %v194_v19, 128  ;;  %196 = vxpose.xlu0.b32.end [2/2] (short) %v193_v21, 128 }
 0x212   :  { %v485_v40 = vpop.xlane.xlu2 %484 }
 0x213   :  { %787 = vrcp.f32 %v485_v40 }
 0x219   :  { %v788_v42 = vpop.eup %787 }
 0x21a   :  { %v502_v41 = vpop.xlane.xlu2 %501  ;;  %v487_v43 = vmul.f32 %v788_v42, %v776_v62  ;;  %v488_v24 = vmul.f32 %v788_v42, %v778_v3  ;;  %v263_v62 = vld [vmem:[%s1222_s1 + $0x20] sm:$0xff]  ;;  %v264_v3 = vld [vmem:[%s1222_s1 + $0x28] sm:$0xff] }
 0x21b   :  { %789 = vrcp.f32 %v502_v41  ;;  %v272_v41 = vld [vmem:[%s1222_s1 + $0x68] sm:$0xff] }
 0x21c   :  { %v489_v46 = vmul.f32 %v487_v43, %v35_v17  ;;  %v490_v48 = vmul.f32 %v488_v24, %v35_v17 }
 0x221   :  { %v790_v44 = vpop.eup %789 }
 0x222   :  { %v504_v45 = vmul.f32 %v790_v44, %v780_v8  ;;  %v505_v27 = vmul.f32 %v790_v44, %v782_v9 }
 0x224   :  { %v506_v23 = vmul.f32 %v504_v45, %v171_v29  ;;  %v507_v47 = vmul.f32 %v505_v27, %v171_v29  ;;  %v700_v45 = vld [vmem:[%s1222_s1 + $0x108] sm:$0xff]  ;;  %v273_v27 = vld [vmem:[%s1222_s1 + $0x70] sm:$0xff] }
 0x226   :  { %v508_v25 = vadd.f32 %v506_v23, %v489_v46  ;;  %v509_v49 = vadd.f32 %v507_v47, %v490_v48  ;;  %v277_v46 = vld [vmem:[%s1222_s1 + $0x90] sm:$0xff] }
 0x227   :  { %v701_v48 = vld [vmem:[%s1222_s1 + $0x110] sm:$0xff] }
 0x228   :  { %v510_v1 = vmul.f32 %v844_v0, %v508_v25  ;;  %v512_v7 = vmul.f32 %v854_v2, %v508_v25  ;;  %v511_v50 = vmul.f32 %v914_v54, %v509_v49  ;;  %v513_v52 = vmul.f32 %v920_v56, %v509_v49  ;;  %v260_v2 = vld [vmem:[%s1222_s1 + $0x8] sm:$0xff]  ;;  %v261_v54 = vld [vmem:[%s1222_s1 + $0x10] sm:$0xff]  ;;  %v278_v49 = vld [vmem:[%s1222_s1 + $0x98] sm:$0xff] }
 0x22a   :  { %514 = vxpose.xlu2.b32.start [1/2] (short) %v510_v1, 128 }
 0x232   :  { %515 = vxpose.xlu2.b32.end [2/2] (short) %v512_v7, 128 }
 0x23b   :  { %546 = vxpose.xlu0.b32.start [1/2] (short) %v511_v50, 128 }
 0x243   :  { %547 = vxpose.xlu0.b32.end [2/2] (short) %v513_v52, 128 }
 0x25f   :  { %v211_v0 = vpop.trf.xlu0  ;;  %v243_v33 = vpop.trf.xlu1 }
 0x260   :  { %v291_v53 = vadd.f32 %v259_v51, %v211_v0  ;;  %v307_v34 = vadd.f32 %v275_v32, %v243_v33  ;;  %v274_v0 = vld [vmem:[%s1222_s1 + $0x78] sm:$0xff] }
 0x261   :  { %v718_v33 = vld [vmem:[%s1222_s1 + $0x198] sm:$0xff] }
 0x262   :  { %324 = vst.msk [vmem:[#allocation3] sm:$0xff] %vm323_vm8, %v291_v53 }
 0x263   :  { %340 = vst.msk [vmem:[#allocation3 + $0x80] sm:$0xff] %vm323_vm8, %v307_v34 }
 0x267   :  { %v212_v55 = vpop.trf.xlu0  ;;  %v244_v19 = vpop.trf.xlu1 }
 0x268   :  { %v292_v57 = vadd.f32 %v260_v2, %v212_v55  ;;  %v308_v21 = vadd.f32 %v276_v39, %v244_v19 }
 0x26a   :  { %325 = vst.msk [vmem:[#allocation3 + $0x8] sm:$0xff] %vm323_vm8, %v292_v57  ;;  %v702_v57 = vld [vmem:[%s1222_s1 + $0x118] sm:$0xff] }
 0x26b   :  { %341 = vst.msk [vmem:[#allocation3 + $0x88] sm:$0xff] %vm323_vm8, %v308_v21 }
 0x26f   :  { %v213_v56 = vpop.trf.xlu0  ;;  %v245_v23 = vpop.trf.xlu1 }
 0x270   :  { %v293_v58 = vadd.f32 %v261_v54, %v213_v56  ;;  %v309_v25 = vadd.f32 %v277_v46, %v245_v23  ;;  %v279_v54 = vld [vmem:[%s1222_s1 + $0xa0] sm:$0xff] }
 0x272   :  { %326 = vst.msk [vmem:[#allocation3 + $0x10] sm:$0xff] %vm323_vm8, %v293_v58 }
 0x273   :  { %342 = vst.msk [vmem:[#allocation3 + $0x90] sm:$0xff] %vm323_vm8, %v309_v25 }
 0x277   :  { %v214_v60 = vpop.trf.xlu0  ;;  %v246_v50 = vpop.trf.xlu1 }
 0x278   :  { %v294_v61 = vadd.f32 %v262_v59, %v214_v60  ;;  %v310_v52 = vadd.f32 %v278_v49, %v246_v50  ;;  %v715_v60 = vld [vmem:[%s1222_s1 + $0x180] sm:$0xff] }
 0x27a   :  { %327 = vst.msk [vmem:[#allocation3 + $0x18] sm:$0xff] %vm323_vm8, %v294_v61 }
 0x27b   :  { %343 = vst.msk [vmem:[#allocation3 + $0x98] sm:$0xff] %vm323_vm8, %v310_v52 }
 0x27f   :  { %v215_v22 = vpop.trf.xlu0  ;;  %v247_v56 = vpop.trf.xlu1 }
 0x280   :  { %v295_v63 = vadd.f32 %v263_v62, %v215_v22  ;;  %v311_v58 = vadd.f32 %v279_v54, %v247_v56 }
 0x282   :  { %328 = vst.msk [vmem:[#allocation3 + $0x20] sm:$0xff] %vm323_vm8, %v295_v63  ;;  %v703_v63 = vld [vmem:[%s1222_s1 + $0x120] sm:$0xff] }
 0x283   :  { %344 = vst.msk [vmem:[#allocation3 + $0xa0] sm:$0xff] %vm323_vm8, %v311_v58 }
 0x287   :  { %v216_v4 = vpop.trf.xlu0 }
 0x288   :  { %v296_v5 = vadd.f32 %v264_v3, %v216_v4  ;;  %v280_v3 = vld [vmem:[%s1222_s1 + $0xa8] sm:$0xff]  ;;  %v248_v4 = vpop.trf.xlu1 }
 0x28a   :  { %329 = vst.msk [vmem:[#allocation3 + $0x28] sm:$0xff] %vm323_vm8, %v296_v5  ;;  %v312_v5 = vadd.f32 %v280_v3, %v248_v4 }
 0x28c   :  { %345 = vst.msk [vmem:[#allocation3 + $0xa8] sm:$0xff] %vm323_vm8, %v312_v5 }
 0x28f   :  { %v217_v8 = vpop.trf.xlu0 }
 0x290   :  { %v297_v9 = vadd.f32 %v265_v6, %v217_v8  ;;  %v716_v8 = vld [vmem:[%s1222_s1 + $0x188] sm:$0xff] }
 0x292   :  { %330 = vst.msk [vmem:[#allocation3 + $0x30] sm:$0xff] %vm323_vm8, %v297_v9 }
 0x297   :  { %v218_v11 = vpop.trf.xlu0 }
 0x298   :  { %v298_v12 = vadd.f32 %v266_v10, %v218_v11 }
 0x29a   :  { %331 = vst.msk [vmem:[#allocation3 + $0x38] sm:$0xff] %vm323_vm8, %v298_v12  ;;  %v704_v12 = vld [vmem:[%s1222_s1 + $0x128] sm:$0xff] }
 0x29f   :  { %v219_v14 = vpop.trf.xlu0 }
 0x2a0   :  { %v299_v15 = vadd.f32 %v267_v13, %v219_v14  ;;  %v281_v13 = vld [vmem:[%s1222_s1 + $0xb0] sm:$0xff]  ;;  %v249_v14 = vpop.trf.xlu1 }
 0x2a2   :  { %332 = vst.msk [vmem:[#allocation3 + $0x40] sm:$0xff] %vm323_vm8, %v299_v15  ;;  %v313_v15 = vadd.f32 %v281_v13, %v249_v14 }
 0x2a4   :  { %346 = vst.msk [vmem:[#allocation3 + $0xb0] sm:$0xff] %vm323_vm8, %v313_v15 }
 0x2a7   :  { %v220_v18 = vpop.trf.xlu0 }
 0x2a8   :  { %v300_v17 = vadd.f32 %v268_v16, %v220_v18  ;;  %v717_v18 = vld [vmem:[%s1222_s1 + $0x190] sm:$0xff] }
 0x2aa   :  { %333 = vst.msk [vmem:[#allocation3 + $0x48] sm:$0xff] %vm323_vm8, %v300_v17 }
 0x2af   :  { %v221_v28 = vpop.trf.xlu0 }
 0x2b0   :  { %v301_v29 = vadd.f32 %v269_v26, %v221_v28 }
 0x2b2   :  { %334 = vst.msk [vmem:[#allocation3 + $0x50] sm:$0xff] %vm323_vm8, %v301_v29  ;;  %v705_v29 = vld [vmem:[%s1222_s1 + $0x130] sm:$0xff] }
 0x2b7   :  { %v222_v30 = vpop.trf.xlu0 }
 0x2b8   :  { %v302_v31 = vadd.f32 %v270_v20, %v222_v30  ;;  %v282_v20 = vld [vmem:[%s1222_s1 + $0xb8] sm:$0xff]  ;;  %v250_v30 = vpop.trf.xlu1 }
 0x2ba   :  { %335 = vst.msk [vmem:[#allocation3 + $0x58] sm:$0xff] %vm323_vm8, %v302_v31  ;;  %v314_v31 = vadd.f32 %v282_v20, %v250_v30 }
 0x2bc   :  { %347 = vst.msk [vmem:[#allocation3 + $0xb8] sm:$0xff] %vm323_vm8, %v314_v31 }
 0x2bf   :  { %v223_v36 = vpop.trf.xlu0 }
 0x2c0   :  { %v303_v37 = vadd.f32 %v271_v35, %v223_v36  ;;  %v251_v39 = vpop.trf.xlu1 }
 0x2c2   :  { %336 = vst.msk [vmem:[#allocation3 + $0x60] sm:$0xff] %vm323_vm8, %v303_v37  ;;  %v706_v37 = vld [vmem:[%s1222_s1 + $0x138] sm:$0xff] }
 0x2c3   :  { %v530_v40 = vpop.trf.xlu2 }
 0x2c4   :  { %v611_v42 = vadd.f32 %v699_v38, %v530_v40  ;;  %v283_v38 = vld [vmem:[%s1222_s1 + $0xc0] sm:$0xff] }
 0x2c5   :  { %v315_v19 = vadd.f32 %v283_v38, %v251_v39  ;;  %v719_v40 = vld [vmem:[%s1222_s1 + $0x1a0] sm:$0xff] }
 0x2c6   :  { %644 = vst.msk [vmem:[#allocation3 + $0x100] sm:$0xff] %vm323_vm8, %v611_v42 }
 0x2c7   :  { %v224_v43 = vpop.trf.xlu0  ;;  %348 = vst.msk [vmem:[#allocation3 + $0xc0] sm:$0xff] %vm323_vm8, %v315_v19 }
 0x2c8   :  { %v304_v44 = vadd.f32 %v272_v41, %v224_v43  ;;  %v252_v46 = vpop.trf.xlu1 }
 0x2ca   :  { %337 = vst.msk [vmem:[#allocation3 + $0x68] sm:$0xff] %vm323_vm8, %v304_v44  ;;  %v707_v44 = vld [vmem:[%s1222_s1 + $0x140] sm:$0xff] }
 0x2cb   :  { %v531_v1 = vpop.trf.xlu2 }
 0x2cc   :  { %v612_v24 = vadd.f32 %v700_v45, %v531_v1  ;;  %v284_v45 = vld [vmem:[%s1222_s1 + $0xc8] sm:$0xff] }
 0x2cd   :  { %v316_v23 = vadd.f32 %v284_v45, %v252_v46  ;;  %v720_v1 = vld [vmem:[%s1222_s1 + $0x1a8] sm:$0xff]  ;;  %v727_v45 = vld [vmem:[%s1222_s1 + $0x1e0] sm:$0xff] }
 0x2ce   :  { %645 = vst.msk [vmem:[#allocation3 + $0x108] sm:$0xff] %vm323_vm8, %v612_v24 }
 0x2cf   :  { %v225_v7 = vpop.trf.xlu0  ;;  %349 = vst.msk [vmem:[#allocation3 + $0xc8] sm:$0xff] %vm323_vm8, %v316_v23 }
 0x2d0   :  { %v305_v47 = vadd.f32 %v273_v27, %v225_v7  ;;  %v253_v49 = vpop.trf.xlu1 }
 0x2d2   :  { %338 = vst.msk [vmem:[#allocation3 + $0x70] sm:$0xff] %vm323_vm8, %v305_v47  ;;  %v708_v47 = vld [vmem:[%s1222_s1 + $0x148] sm:$0xff] }
 0x2d3   :  { %v532_v51 = vpop.trf.xlu2 }
 0x2d4   :  { %v613_v53 = vadd.f32 %v701_v48, %v532_v51  ;;  %v285_v48 = vld [vmem:[%s1222_s1 + $0xd0] sm:$0xff] }
 0x2d5   :  { %v317_v50 = vadd.f32 %v285_v48, %v253_v49  ;;  %v721_v51 = vld [vmem:[%s1222_s1 + $0x1b0] sm:$0xff]  ;;  %v730_v49 = vld [vmem:[%s1222_s1 + $0x1f8] sm:$0xff] }
 0x2d6   :  { %646 = vst.msk [vmem:[#allocation3 + $0x110] sm:$0xff] %vm323_vm8, %v613_v53 }
 0x2d7   :  { %v226_v2 = vpop.trf.xlu0  ;;  %350 = vst.msk [vmem:[#allocation3 + $0xd0] sm:$0xff] %vm323_vm8, %v317_v50 }
 0x2d8   :  { %v306_v55 = vadd.f32 %v274_v0, %v226_v2  ;;  %v254_v54 = vpop.trf.xlu1 }
 0x2da   :  { %339 = vst.msk [vmem:[#allocation3 + $0x78] sm:$0xff] %vm323_vm8, %v306_v55  ;;  %v709_v55 = vld [vmem:[%s1222_s1 + $0x150] sm:$0xff] }
 0x2db   :  { %v533_v59 = vpop.trf.xlu2 }
 0x2dc   :  { %v614_v61 = vadd.f32 %v702_v57, %v533_v59  ;;  %v286_v57 = vld [vmem:[%s1222_s1 + $0xd8] sm:$0xff] }
 0x2dd   :  { %v318_v56 = vadd.f32 %v286_v57, %v254_v54  ;;  %v722_v59 = vld [vmem:[%s1222_s1 + $0x1b8] sm:$0xff] }
 0x2de   :  { %647 = vst.msk [vmem:[#allocation3 + $0x118] sm:$0xff] %vm323_vm8, %v614_v61 }
 0x2df   :  { %v562_v62 = vpop.trf.xlu0  ;;  %351 = vst.msk [vmem:[#allocation3 + $0xd8] sm:$0xff] %vm323_vm8, %v318_v56 }
 0x2e0   :  { %v627_v22 = vadd.f32 %v715_v60, %v562_v62  ;;  %v255_v3 = vpop.trf.xlu1 }
 0x2e2   :  { %660 = vst.msk [vmem:[#allocation3 + $0x180] sm:$0xff] %vm323_vm8, %v627_v22  ;;  %v710_v22 = vld [vmem:[%s1222_s1 + $0x158] sm:$0xff] }
 0x2e3   :  { %v534_v6 = vpop.trf.xlu2 }
 0x2e4   :  { %v615_v9 = vadd.f32 %v703_v63, %v534_v6  ;;  %v287_v63 = vld [vmem:[%s1222_s1 + $0xe0] sm:$0xff] }
 0x2e5   :  { %v319_v4 = vadd.f32 %v287_v63, %v255_v3  ;;  %v723_v6 = vld [vmem:[%s1222_s1 + $0x1c0] sm:$0xff] }
 0x2e6   :  { %648 = vst.msk [vmem:[#allocation3 + $0x120] sm:$0xff] %vm323_vm8, %v615_v9 }
 0x2e7   :  { %v563_v10 = vpop.trf.xlu0  ;;  %352 = vst.msk [vmem:[#allocation3 + $0xe0] sm:$0xff] %vm323_vm8, %v319_v4 }
 0x2e8   :  { %v628_v11 = vadd.f32 %v716_v8, %v563_v10  ;;  %v256_v13 = vpop.trf.xlu1 }
 0x2ea   :  { %661 = vst.msk [vmem:[#allocation3 + $0x188] sm:$0xff] %vm323_vm8, %v628_v11  ;;  %v711_v11 = vld [vmem:[%s1222_s1 + $0x160] sm:$0xff] }
 0x2eb   :  { %v535_v16 = vpop.trf.xlu2 }
 0x2ec   :  { %v616_v17 = vadd.f32 %v704_v12, %v535_v16  ;;  %v288_v12 = vld [vmem:[%s1222_s1 + $0xe8] sm:$0xff] }
 0x2ed   :  { %v320_v14 = vadd.f32 %v288_v12, %v256_v13  ;;  %v724_v16 = vld [vmem:[%s1222_s1 + $0x1c8] sm:$0xff] }
 0x2ee   :  { %649 = vst.msk [vmem:[#allocation3 + $0x128] sm:$0xff] %vm323_vm8, %v616_v17 }
 0x2ef   :  { %v564_v26 = vpop.trf.xlu0  ;;  %353 = vst.msk [vmem:[#allocation3 + $0xe8] sm:$0xff] %vm323_vm8, %v320_v14 }
 0x2f0   :  { %v629_v28 = vadd.f32 %v717_v18, %v564_v26  ;;  %v257_v20 = vpop.trf.xlu1 }
 0x2f2   :  { %662 = vst.msk [vmem:[#allocation3 + $0x190] sm:$0xff] %vm323_vm8, %v629_v28  ;;  %v712_v28 = vld [vmem:[%s1222_s1 + $0x168] sm:$0xff] }
 0x2f3   :  { %v536_v32 = vpop.trf.xlu2 }
 0x2f4   :  { %v617_v34 = vadd.f32 %v705_v29, %v536_v32  ;;  %v289_v29 = vld [vmem:[%s1222_s1 + $0xf0] sm:$0xff] }
 0x2f5   :  { %v321_v30 = vadd.f32 %v289_v29, %v257_v20  ;;  %v725_v32 = vld [vmem:[%s1222_s1 + $0x1d0] sm:$0xff] }
 0x2f6   :  { %650 = vst.msk [vmem:[#allocation3 + $0x130] sm:$0xff] %vm323_vm8, %v617_v34 }
 0x2f7   :  { %v565_v35 = vpop.trf.xlu0  ;;  %354 = vst.msk [vmem:[#allocation3 + $0xf0] sm:$0xff] %vm323_vm8, %v321_v30 }
 0x2f8   :  { %v630_v36 = vadd.f32 %v718_v33, %v565_v35  ;;  %v258_v38 = vpop.trf.xlu1 }
 0x2fa   :  { %663 = vst.msk [vmem:[#allocation3 + $0x198] sm:$0xff] %vm323_vm8, %v630_v36  ;;  %v713_v36 = vld [vmem:[%s1222_s1 + $0x170] sm:$0xff] }
 0x2fb   :  { %v537_v21 = vpop.trf.xlu2 }
 0x2fc   :  { %v618_v41 = vadd.f32 %v706_v37, %v537_v21  ;;  %v290_v37 = vld [vmem:[%s1222_s1 + $0xf8] sm:$0xff] }
 0x2fd   :  { %v322_v39 = vadd.f32 %v290_v37, %v258_v38  ;;  %v726_v21 = vld [vmem:[%s1222_s1 + $0x1d8] sm:$0xff] }
 0x2fe   :  { %651 = vst.msk [vmem:[#allocation3 + $0x138] sm:$0xff] %vm323_vm8, %v618_v41 }
 0x2ff   :  { %v566_v42 = vpop.trf.xlu0  ;;  %355 = vst.msk [vmem:[#allocation3 + $0xf8] sm:$0xff] %vm323_vm8, %v322_v39 }
 0x300   :  { %v631_v43 = vadd.f32 %v719_v40, %v566_v42 }
 0x302   :  { %664 = vst.msk [vmem:[#allocation3 + $0x1a0] sm:$0xff] %vm323_vm8, %v631_v43  ;;  %v714_v43 = vld [vmem:[%s1222_s1 + $0x178] sm:$0xff] }
 0x303   :  { %v538_v25 = vpop.trf.xlu2 }
 0x304   :  { %v619_v27 = vadd.f32 %v707_v44, %v538_v25 }
 0x306   :  { %652 = vst.msk [vmem:[#allocation3 + $0x140] sm:$0xff] %vm323_vm8, %v619_v27 }
 0x307   :  { %v567_v24 = vpop.trf.xlu0 }
 0x308   :  { %v632_v7 = vadd.f32 %v720_v1, %v567_v24  ;;  %v728_v1 = vld [vmem:[%s1222_s1 + $0x1e8] sm:$0xff] }
 0x30a   :  { %665 = vst.msk [vmem:[#allocation3 + $0x1a8] sm:$0xff] %vm323_vm8, %v632_v7  ;;  %v729_v7 = vld [vmem:[%s1222_s1 + $0x1f0] sm:$0xff] }
 0x30b   :  { %v539_v52 = vpop.trf.xlu2 }
 0x30c   :  { %v620_v0 = vadd.f32 %v708_v47, %v539_v52 }
 0x30e   :  { %653 = vst.msk [vmem:[#allocation3 + $0x148] sm:$0xff] %vm323_vm8, %v620_v0 }
 0x30f   :  { %v568_v53 = vpop.trf.xlu0 }
 0x310   :  { %v633_v2 = vadd.f32 %v721_v51, %v568_v53 }
 0x312   :  { %666 = vst.msk [vmem:[#allocation3 + $0x1b0] sm:$0xff] %vm323_vm8, %v633_v2 }
 0x313   :  { %v540_v58 = vpop.trf.xlu2 }
 0x314   :  { %v621_v60 = vadd.f32 %v709_v55, %v540_v58 }
 0x316   :  { %654 = vst.msk [vmem:[#allocation3 + $0x150] sm:$0xff] %vm323_vm8, %v621_v60 }
 0x317   :  { %v569_v61 = vpop.trf.xlu0 }
 0x318   :  { %v634_v62 = vadd.f32 %v722_v59, %v569_v61 }
 0x31a   :  { %667 = vst.msk [vmem:[#allocation3 + $0x1b8] sm:$0xff] %vm323_vm8, %v634_v62 }
 0x31b   :  { %v541_v5 = vpop.trf.xlu2 }
 0x31c   :  { %v622_v8 = vadd.f32 %v710_v22, %v541_v5 }
 0x31e   :  { %655 = vst.msk [vmem:[#allocation3 + $0x158] sm:$0xff] %vm323_vm8, %v622_v8 }
 0x31f   :  { %v570_v9 = vpop.trf.xlu0 }
 0x320   :  { %v635_v10 = vadd.f32 %v723_v6, %v570_v9 }
 0x322   :  { %668 = vst.msk [vmem:[#allocation3 + $0x1c0] sm:$0xff] %vm323_vm8, %v635_v10 }
 0x323   :  { %v542_v15 = vpop.trf.xlu2 }
 0x324   :  { %v623_v18 = vadd.f32 %v711_v11, %v542_v15 }
 0x326   :  { %656 = vst.msk [vmem:[#allocation3 + $0x160] sm:$0xff] %vm323_vm8, %v623_v18 }
 0x327   :  { %v571_v17 = vpop.trf.xlu0 }
 0x328   :  { %v636_v26 = vadd.f32 %v724_v16, %v571_v17 }
 0x32a   :  { %669 = vst.msk [vmem:[#allocation3 + $0x1c8] sm:$0xff] %vm323_vm8, %v636_v26 }
 0x32b   :  { %v543_v31 = vpop.trf.xlu2 }
 0x32c   :  { %v624_v33 = vadd.f32 %v712_v28, %v543_v31 }
 0x32e   :  { %657 = vst.msk [vmem:[#allocation3 + $0x168] sm:$0xff] %vm323_vm8, %v624_v33 }
 0x32f   :  { %v572_v34 = vpop.trf.xlu0 }
 0x330   :  { %v637_v35 = vadd.f32 %v725_v32, %v572_v34 }
 0x332   :  { %670 = vst.msk [vmem:[#allocation3 + $0x1d0] sm:$0xff] %vm323_vm8, %v637_v35 }
 0x333   :  { %v544_v19 = vpop.trf.xlu2 }
 0x334   :  { %v625_v40 = vadd.f32 %v713_v36, %v544_v19 }
 0x336   :  { %658 = vst.msk [vmem:[#allocation3 + $0x170] sm:$0xff] %vm323_vm8, %v625_v40 }
 0x337   :  { %v573_v41 = vpop.trf.xlu0 }
 0x338   :  { %v638_v42 = vadd.f32 %v726_v21, %v573_v41 }
 0x33a   :  { %671 = vst.msk [vmem:[#allocation3 + $0x1d8] sm:$0xff] %vm323_vm8, %v638_v42 }
 0x33b   :  { %v545_v44 = vpop.trf.xlu2 }
 0x33c   :  { %v626_v46 = vadd.f32 %v714_v43, %v545_v44 }
 0x33e   :  { %659 = vst.msk [vmem:[#allocation3 + $0x178] sm:$0xff] %vm323_vm8, %v626_v46 }
 0x33f   :  { %v574_v23 = vpop.trf.xlu0 }
 0x340   :  { %v639_v25 = vadd.f32 %v727_v45, %v574_v23 }
 0x342   :  { %672 = vst.msk [vmem:[#allocation3 + $0x1e0] sm:$0xff] %vm323_vm8, %v639_v25 }
 0x347   :  { %v575_v27 = vpop.trf.xlu0 }
 0x348   :  { %v640_v24 = vadd.f32 %v728_v1, %v575_v27 }
 0x34a   :  { %673 = vst.msk [vmem:[#allocation3 + $0x1e8] sm:$0xff] %vm323_vm8, %v640_v24 }
 0x34f   :  { %v576_v47 = vpop.trf.xlu0 }
 0x350   :  { %v641_v48 = vadd.f32 %v729_v7, %v576_v47 }
 0x352   :  { %674 = vst.msk [vmem:[#allocation3 + $0x1f0] sm:$0xff] %vm323_vm8, %v641_v48 }
 0x357   :  { %v577_v50 = vpop.trf.xlu0 }
 0x358   :  { %v642_v52 = vadd.f32 %v730_v49, %v577_v50 }
 0x35a   :  { %675 = vst.msk [vmem:[#allocation3 + $0x1f8] sm:$0xff] %vm323_vm8, %v642_v52 }
 0x35b   :  { %688 = dma.vmem_to_hbm [thread:$0]  %s681_s12, 8192, %s683_s15, [#allocation4], %s819_s18, %s819_s18, %s820_s19  }
 0x35c   :  { %815 = dma.done.wait [#allocation4], 8192  }
 0x35d   :  { %816 = vsyncadd [#allocation4], 4294959104 }
 0x35e   :  { %693 = vsyncpa [#allocation4], 1 }

</bundles_post_ra>
